<compile_context>
chip_gen: v6e
topology: v6e:2x2x1
jax: 0.10.0
libtpu: 0.0.40
codegen_flags: <defaults>
</compile_context>

<pallas_src>
import functools
import math

import jax
import jax.numpy as jnp
from jax import lax
from jax.experimental import pallas as pl
from jax.experimental.pallas import tpu as pltpu


def _round_up(x, m):
    return ((x + m - 1) // m) * m


def rnn_chunk_kernel(xwb_ref, whh_t_ref, h_out_ref, h_scratch, *, unroll):
    """One (batch block, time chunk) grid step of the recurrence.

    xwb_ref   : (Tt, Bb, Hp)  hoisted input projection + combined biases (time-major slab)
    whh_t_ref : (Hp, Hp)      W_hh^T, resident across grid steps
    h_out_ref : (Bb, Hp)      final hidden state for this batch block (written on last t chunk)
    h_scratch : (Bb, Hp)      recurrent hidden state, persists across time chunks
    """
    t_chunk = pl.program_id(1)

    @pl.when(t_chunk == 0)
    def _init():
        h_scratch[...] = jnp.zeros_like(h_scratch)

    whh_t = whh_t_ref[...]
    tt = xwb_ref.shape[0]

    def step(t, h):
        # One MXU matmul + EUP tanh per timestep on the latency-critical chain;
        # xwb[t] already holds x_t @ W_ih^T + (b_ih + b_hh).
        return jnp.tanh(
            xwb_ref[t] + jnp.dot(h, whh_t, preferred_element_type=jnp.float32)
        )

    # h stays in vregs across the chunk; scratch is touched once per chunk.
    h = lax.fori_loop(0, tt, step, h_scratch[...], unroll=unroll)
    h_scratch[...] = h

    @pl.when(t_chunk == pl.num_programs(1) - 1)
    def _finalize():
        h_out_ref[...] = h


def simple_rnn_forward(x, params, *, vmem_budget_bytes=24 * 1024 * 1024):
    """x: (B, T, D_in) batch-first float32. Returns (B, O), matching the PyTorch forward."""
    B, T, D = x.shape
    H = params["w_hh"].shape[0]

    B_pad = _round_up(max(B, 8), 8)       # sublane-native batch
    H_pad = _round_up(max(H, 128), 128)   # lane-native hidden

    # Batch block: single block at small B; splits into 2 parallel blocks at realistic B
    # so v7x's second TensorCore can pick up half the batch (neutral on v5e/v6e).
    bb = B_pad // 2 if (B_pad >= 16 and (B_pad // 2) % 8 == 0) else B_pad
    nb = B_pad // bb

    # Time chunk: largest divisor of T whose double-buffered xwb slab + residents fit budget.
    resident_bytes = H_pad * H_pad * 4 + 2 * bb * H_pad * 4        # W_hh^T + h_scratch + out block
    per_tt_bytes = 2 * bb * H_pad * 4                               # 2 pipeline buffers of one row of time
    cap_tt = max(1, (vmem_budget_bytes - resident_bytes) // per_tt_bytes)
    tt = 1
    for cand in range(min(T, cap_tt), 0, -1):
        if T % cand == 0:
            tt = cand
            break
    nt = T // tt

    f32 = jnp.float32
    hi = jax.lax.Precision.HIGHEST

    # Zero-padded weights (padded rows/cols contribute exact zeros to the recurrence).
    wih_t = jnp.zeros((D, H_pad), f32).at[:, :H].set(params["w_ih"].T.astype(f32))
    whh_t = jnp.zeros((H_pad, H_pad), f32).at[:H, :H].set(params["w_hh"].T.astype(f32))
    bias = jnp.zeros((H_pad,), f32).at[:H].set((params["b_ih"] + params["b_hh"]).astype(f32))

    # Hoisted input projection, emitted directly time-major: transpose the *small* (B,T,D)
    # input once, then one big matmul -> (T, B_pad, H_pad).  No (T,B,H) transpose after
    # the matmul, no per-timestep input matmul on the serial chain.
    x_tm = jnp.transpose(x.astype(f32), (1, 0, 2))                  # (T, B, D)
    x_tm = jnp.pad(x_tm, ((0, 0), (0, B_pad - B), (0, 0)))          # (T, B_pad, D)
    xwb = (jnp.dot(x_tm.reshape(T * B_pad, D), wih_t, precision=hi) + bias
           ).reshape(T, B_pad, H_pad)

    kernel = functools.partial(rnn_chunk_kernel, unroll=min(tt, 8))

    h_final = pl.pallas_call(
        kernel,
        out_shape=jax.ShapeDtypeStruct((B_pad, H_pad), f32),
        grid_spec=pltpu.PrefetchScalarGridSpec(
            num_scalar_prefetch=0,
            grid=(nb, nt),
            in_specs=[
                pl.BlockSpec((tt, bb, H_pad), lambda b, t: (t, b, 0)),  # xwb: streamed per chunk
                pl.BlockSpec((H_pad, H_pad), lambda b, t: (0, 0)),      # W_hh^T: resident
            ],
            out_specs=pl.BlockSpec((bb, H_pad), lambda b, t: (b, 0)),
            scratch_shapes=[pltpu.VMEM((bb, H_pad), f32)],
        ),
        compiler_params=pltpu.CompilerParams(
            # batch axis independent -> parallel (v7x megacore); time carries the recurrence.
            dimension_semantics=("parallel", "arbitrary"),
            vmem_limit_bytes=32 * 1024 * 1024,
        ),
    )(xwb, whh_t)

    # FC head on the last hidden state: tiny (B,H)@(H,O) matmul, done in the wrapper so
    # W_fc/b_fc never occupy kernel VMEM.
    h_last = h_final[:B, :H]
    out = jnp.dot(h_last, params["w_fc"].T.astype(f32), precision=hi) + params["b_fc"].astype(f32)
    return out


def init_params(key, input_size=4, hidden_size=16, output_size=1):
    """Deterministic init mimicking PyTorch's U(-1/sqrt(H), 1/sqrt(H))."""
    ks = jax.random.split(key, 6)
    bound = 1.0 / math.sqrt(hidden_size)
    u = lambda k, shape, b: jax.random.uniform(k, shape, jnp.float32, -b, b)
    return {
        "w_ih": u(ks[0], (hidden_size, input_size), bound),
        "w_hh": u(ks[1], (hidden_size, hidden_size), bound),
        "b_ih": u(ks[2], (hidden_size,), bound),
        "b_hh": u(ks[3], (hidden_size,), bound),
        "w_fc": u(ks[4], (output_size, hidden_size), bound),
        "b_fc": u(ks[5], (output_size,), bound),
    }


def reference_forward(x, params):
    """Pure-JAX reference of the PyTorch forward, for a sanity check."""
    B, T, D = x.shape
    H = params["w_hh"].shape[0]
    hi = jax.lax.Precision.HIGHEST
    h = jnp.zeros((B, H), jnp.float32)
    for t in range(T):
        h = jnp.tanh(jnp.dot(x[:, t, :], params["w_ih"].T, precision=hi) + params["b_ih"]
                     + jnp.dot(h, params["w_hh"].T, precision=hi) + params["b_hh"])
    return jnp.dot(h, params["w_fc"].T, precision=hi) + params["b_fc"]


if __name__ == "__main__":
    key = jax.random.PRNGKey(0)
    kx, kp = jax.random.split(key)

    B, T, D_in, H, O = 2, 8, 4, 16, 1
    x = jax.random.normal(kx, (B, T, D_in), jnp.float32)
    params = init_params(kp, input_size=D_in, hidden_size=H, output_size=O)

    out = simple_rnn_forward(x, params)
    out = jax.block_until_ready(out)

    ref = reference_forward(x, params)
    assert out.shape == (B, O), out.shape
    assert jnp.allclose(out, ref, atol=1e-4, rtol=1e-4), (out, ref)

    print("KERNEL_OK")
</pallas_src>

<mosaic_0001>
module attributes {stable_mosaic.version = 11 : i64} {
  func.func @rnn_chunk_kernel(%arg0: i32, %arg1: i32, %arg2: memref<8x8x128xf32, #tpu.memory_space<vmem>>, %arg3: memref<128x128xf32, #tpu.memory_space<vmem>>, %arg4: memref<8x128xf32, #tpu.memory_space<vmem>>, %arg5: memref<8x128xf32, #tpu.memory_space<vmem>>) attributes {dimension_semantics = [#tpu.dimension_semantics<parallel>, #tpu.dimension_semantics<arbitrary>], iteration_bounds = array<i64: 1, 1>, scalar_prefetch = 0 : i64, scratch_operands = 1 : i64, tpu.core_type = #tpu.core_type<tc>, window_params = [{transform_indices = @transform_0, window_bounds = array<i64: 8, 8, 128>}, {pipeline_mode = #tpu.pipeline_mode<synchronous>, transform_indices = @transform_1, window_bounds = array<i64: 128, 128>}, {transform_indices = @transform_2, window_bounds = array<i64: 8, 128>}]} {
    %c0_i32 = arith.constant 0 : i32
    %0 = arith.cmpi eq, %arg1, %c0_i32 : i32
    %1 = arith.extui %0 : i1 to i32
    %c0_i32_0 = arith.constant 0 : i32
    %2 = arith.cmpi ne, %1, %c0_i32_0 : i32
    scf.if %2 {
      %cst_32 = arith.constant 0.000000e+00 : f32
      %57 = vector.broadcast %cst_32 : f32 to vector<8x128xf32>
      %c0_33 = arith.constant 0 : index
      %c0_34 = arith.constant 0 : index
      %58 = vector.load %arg5[%c0_33, %c0_34] : memref<8x128xf32, #tpu.memory_space<vmem>>, vector<8x128xf32>
      tpu.vector_store %arg5[%c0_33, %c0_34], %57 {strides = array<i32>} : memref<8x128xf32, #tpu.memory_space<vmem>>, vector<8x128xf32>,
    } else {
    }
    %c0 = arith.constant 0 : index
    %c0_1 = arith.constant 0 : index
    %3 = vector.load %arg3[%c0, %c0_1] : memref<128x128xf32, #tpu.memory_space<vmem>>, vector<128x128xf32>
    %c0_2 = arith.constant 0 : index
    %c0_3 = arith.constant 0 : index
    %4 = vector.load %arg5[%c0_2, %c0_3] : memref<8x128xf32, #tpu.memory_space<vmem>>, vector<8x128xf32>
    %c0_i32_4 = arith.constant 0 : i32
    %5 = arith.index_cast %c0_i32_4 : i32 to index
    %c0_5 = arith.constant 0 : index
    %c0_6 = arith.constant 0 : index
    %6 = vector.load %arg2[%5, %c0_5, %c0_6] : memref<8x8x128xf32, #tpu.memory_space<vmem>>, vector<1x8x128xf32>
    %7 = vector.shape_cast %6 : vector<1x8x128xf32> to vector<8x128xf32>
    %cst = arith.constant dense<0.000000e+00> : vector<8x128xf32>
    %8 = tpu.matmul %4, %3, %cst {dimension_numbers = #tpu.dot_dimension_numbers<[1], [0], [0], [1], [0, 0, 1, 1], [], []>} : vector<8x128xf32>, vector<128x128xf32>, vector<8x128xf32> -> vector<8x128xf32>
    %9 = arith.addf %7, %8 : vector<8x128xf32>
    %10 = math.tanh %9 : vector<8x128xf32>
    %c1_i32 = arith.constant 1 : i32
    %11 = arith.index_cast %c1_i32 : i32 to index
    %c0_7 = arith.constant 0 : index
    %c0_8 = arith.constant 0 : index
    %12 = vector.load %arg2[%11, %c0_7, %c0_8] : memref<8x8x128xf32, #tpu.memory_space<vmem>>, vector<1x8x128xf32>
    %13 = vector.shape_cast %12 : vector<1x8x128xf32> to vector<8x128xf32>
    %cst_9 = arith.constant dense<0.000000e+00> : vector<8x128xf32>
    %14 = tpu.matmul %10, %3, %cst_9 {dimension_numbers = #tpu.dot_dimension_numbers<[1], [0], [0], [1], [0, 0, 1, 1], [], []>} : vector<8x128xf32>, vector<128x128xf32>, vector<8x128xf32> -> vector<8x128xf32>
    %15 = arith.addf %13, %14 : vector<8x128xf32>
    %16 = math.tanh %15 : vector<8x128xf32>
    %c2_i32 = arith.constant 2 : i32
    %17 = arith.index_cast %c2_i32 : i32 to index
    %c0_10 = arith.constant 0 : index
    %c0_11 = arith.constant 0 : index
    %18 = vector.load %arg2[%17, %c0_10, %c0_11] : memref<8x8x128xf32, #tpu.memory_space<vmem>>, vector<1x8x128xf32>
    %19 = vector.shape_cast %18 : vector<1x8x128xf32> to vector<8x128xf32>
    %cst_12 = arith.constant dense<0.000000e+00> : vector<8x128xf32>
    %20 = tpu.matmul %16, %3, %cst_12 {dimension_numbers = #tpu.dot_dimension_numbers<[1], [0], [0], [1], [0, 0, 1, 1], [], []>} : vector<8x128xf32>, vector<128x128xf32>, vector<8x128xf32> -> vector<8x128xf32>
    %21 = arith.addf %19, %20 : vector<8x128xf32>
    %22 = math.tanh %21 : vector<8x128xf32>
    %c3_i32 = arith.constant 3 : i32
    %23 = arith.index_cast %c3_i32 : i32 to index
    %c0_13 = arith.constant 0 : index
    %c0_14 = arith.constant 0 : index
    %24 = vector.load %arg2[%23, %c0_13, %c0_14] : memref<8x8x128xf32, #tpu.memory_space<vmem>>, vector<1x8x128xf32>
    %25 = vector.shape_cast %24 : vector<1x8x128xf32> to vector<8x128xf32>
    %cst_15 = arith.constant dense<0.000000e+00> : vector<8x128xf32>
    %26 = tpu.matmul %22, %3, %cst_15 {dimension_numbers = #tpu.dot_dimension_numbers<[1], [0], [0], [1], [0, 0, 1, 1], [], []>} : vector<8x128xf32>, vector<128x128xf32>, vector<8x128xf32> -> vector<8x128xf32>
    %27 = arith.addf %25, %26 : vector<8x128xf32>
    %28 = math.tanh %27 : vector<8x128xf32>
    %c4_i32 = arith.constant 4 : i32
    %29 = arith.index_cast %c4_i32 : i32 to index
    %c0_16 = arith.constant 0 : index
    %c0_17 = arith.constant 0 : index
    %30 = vector.load %arg2[%29, %c0_16, %c0_17] : memref<8x8x128xf32, #tpu.memory_space<vmem>>, vector<1x8x128xf32>
    %31 = vector.shape_cast %30 : vector<1x8x128xf32> to vector<8x128xf32>
    %cst_18 = arith.constant dense<0.000000e+00> : vector<8x128xf32>
    %32 = tpu.matmul %28, %3, %cst_18 {dimension_numbers = #tpu.dot_dimension_numbers<[1], [0], [0], [1], [0, 0, 1, 1], [], []>} : vector<8x128xf32>, vector<128x128xf32>, vector<8x128xf32> -> vector<8x128xf32>
    %33 = arith.addf %31, %32 : vector<8x128xf32>
    %34 = math.tanh %33 : vector<8x128xf32>
    %c5_i32 = arith.constant 5 : i32
    %35 = arith.index_cast %c5_i32 : i32 to index
    %c0_19 = arith.constant 0 : index
    %c0_20 = arith.constant 0 : index
    %36 = vector.load %arg2[%35, %c0_19, %c0_20] : memref<8x8x128xf32, #tpu.memory_space<vmem>>, vector<1x8x128xf32>
    %37 = vector.shape_cast %36 : vector<1x8x128xf32> to vector<8x128xf32>
    %cst_21 = arith.constant dense<0.000000e+00> : vector<8x128xf32>
    %38 = tpu.matmul %34, %3, %cst_21 {dimension_numbers = #tpu.dot_dimension_numbers<[1], [0], [0], [1], [0, 0, 1, 1], [], []>} : vector<8x128xf32>, vector<128x128xf32>, vector<8x128xf32> -> vector<8x128xf32>
    %39 = arith.addf %37, %38 : vector<8x128xf32>
    %40 = math.tanh %39 : vector<8x128xf32>
    %c6_i32 = arith.constant 6 : i32
    %41 = arith.index_cast %c6_i32 : i32 to index
    %c0_22 = arith.constant 0 : index
    %c0_23 = arith.constant 0 : index
    %42 = vector.load %arg2[%41, %c0_22, %c0_23] : memref<8x8x128xf32, #tpu.memory_space<vmem>>, vector<1x8x128xf32>
    %43 = vector.shape_cast %42 : vector<1x8x128xf32> to vector<8x128xf32>
    %cst_24 = arith.constant dense<0.000000e+00> : vector<8x128xf32>
    %44 = tpu.matmul %40, %3, %cst_24 {dimension_numbers = #tpu.dot_dimension_numbers<[1], [0], [0], [1], [0, 0, 1, 1], [], []>} : vector<8x128xf32>, vector<128x128xf32>, vector<8x128xf32> -> vector<8x128xf32>
    %45 = arith.addf %43, %44 : vector<8x128xf32>
    %46 = math.tanh %45 : vector<8x128xf32>
    %c7_i32 = arith.constant 7 : i32
    %47 = arith.index_cast %c7_i32 : i32 to index
    %c0_25 = arith.constant 0 : index
    %c0_26 = arith.constant 0 : index
    %48 = vector.load %arg2[%47, %c0_25, %c0_26] : memref<8x8x128xf32, #tpu.memory_space<vmem>>, vector<1x8x128xf32>
    %49 = vector.shape_cast %48 : vector<1x8x128xf32> to vector<8x128xf32>
    %cst_27 = arith.constant dense<0.000000e+00> : vector<8x128xf32>
    %50 = tpu.matmul %46, %3, %cst_27 {dimension_numbers = #tpu.dot_dimension_numbers<[1], [0], [0], [1], [0, 0, 1, 1], [], []>} : vector<8x128xf32>, vector<128x128xf32>, vector<8x128xf32> -> vector<8x128xf32>
    %51 = arith.addf %49, %50 : vector<8x128xf32>
    %52 = math.tanh %51 : vector<8x128xf32>
    %c8_i32 = arith.constant 8 : i32
    %c0_28 = arith.constant 0 : index
    %c0_29 = arith.constant 0 : index
    %53 = vector.load %arg5[%c0_28, %c0_29] : memref<8x128xf32, #tpu.memory_space<vmem>>, vector<8x128xf32>
    tpu.vector_store %arg5[%c0_28, %c0_29], %52 {strides = array<i32>} : memref<8x128xf32, #tpu.memory_space<vmem>>, vector<8x128xf32>,
    %c0_i32_30 = arith.constant 0 : i32
    %54 = arith.cmpi eq, %arg1, %c0_i32_30 : i32
    %55 = arith.extui %54 : i1 to i32
    %c0_i32_31 = arith.constant 0 : i32
    %56 = arith.cmpi ne, %55, %c0_i32_31 : i32
    scf.if %56 {
      %c0_32 = arith.constant 0 : index
      %c0_33 = arith.constant 0 : index
      %57 = vector.load %arg4[%c0_32, %c0_33] : memref<8x128xf32, #tpu.memory_space<vmem>>, vector<8x128xf32>
      tpu.vector_store %arg4[%c0_32, %c0_33], %52 {strides = array<i32>} : memref<8x128xf32, #tpu.memory_space<vmem>>, vector<8x128xf32>,
    } else {
    }
    return
  }
  func.func @transform_0(%arg0: i32, %arg1: i32) -> (i32, i32, i32) {
    %c0_i32 = arith.constant 0 : i32
    %c0_i32_0 = arith.constant 0 : i32
    return %arg1, %arg0, %c0_i32 : i32, i32, i32
  }
  func.func @transform_1(%arg0: i32, %arg1: i32) -> (i32, i32) {
    %c0_i32 = arith.constant 0 : i32
    %c0_i32_0 = arith.constant 0 : i32
    %c0_i32_1 = arith.constant 0 : i32
    return %c0_i32, %c0_i32_0 : i32, i32
  }
  func.func @transform_2(%arg0: i32, %arg1: i32) -> (i32, i32) {
    %c0_i32 = arith.constant 0 : i32
    %c0_i32_0 = arith.constant 0 : i32
    return %arg0, %c0_i32 : i32, i32
  }
}

</mosaic_0001>

<bundles_post_ra>
// kernel: tpu_custom_call.1
= control target key start
LH: loop header
LB: loop body
LE: loop exit
PB: predicated region body
PF: predicated region fallthrough
CT: control target
= control target key end

     0   :  { %7 = vsyncpa [#allocation4], 0  ;;  %s1515_s0 = inlined_call_operand.hbm [shape: f32[8,8,128], index: 0, kind: input, shape index: {}]   ;;  %s1516_s1 = inlined_call_operand.hbm [shape: f32[128,128], index: 1, kind: input, shape index: {}]   ;;  %s1517_s2 = inlined_call_operand.hbm [shape: f32[8,128], index: 2, kind: output, shape index: {}]  }
   0x1   :  { %8 = vsyncpa [#allocation7], 0 }
   0x2   :  { %9 = vsyncpa [#allocation5], 0  ;;  %s1179_s9 = smov [#allocation3]  }
   0x3   :  { %s15_s10 = sshll.u32 %s1179_s9, 4  ;;  %s16_s10 = int_to_ptr.vmem [resolvable:$true] %s15_s10 }
   0x4   :  { %s1121_s11 = scalar_lea.vmem %s16_s10, 1024  ;;  %p1126_p1 = scmp.lt.s32.totalorder %s16_s10, %s16_s10 }
   0x5   :  { %p1122_p0 = scmp.ne.s32.totalorder %s16_s10, %s1121_s11  ;;  %p1127_p2 = scmp.lt.s32.totalorder %s1121_s11, %s1121_s11 }
   0x7   :  { %p1128_p3 = por %p1127_p2, %p1126_p1 }
   0x9   :  { %p1129_p4 = pnand %p1128_p3, %p1122_p0 }
   0xb   :  { %1132 = shalt.err (!%p1129_p4)
}
   0xc   :  { %s1180_s12 = smov 128   ;;  %s1181_s13 = smov 8  }
   0xd   :  { %21 = dma.hbm_to_vmem [thread:$0]  %s1515_s0, 1024, %s16_s10, [#allocation4], %s1180_s12, %s1180_s12, %s1181_s13  }
   0xe   :  { %s1182_s16 = smov [#allocation6]  }
   0xf   :  { %s27_s17 = sshll.u32 %s1182_s16, 4  ;;  %s28_s17 = int_to_ptr.vmem [resolvable:$true] %s27_s17 }
  0x10   :  { %s1141_s18 = scalar_lea.vmem %s28_s17, 2048  ;;  %p1146_p6 = scmp.lt.s32.totalorder %s28_s17, %s28_s17 }
  0x11   :  { %p1142_p5 = scmp.ne.s32.totalorder %s28_s17, %s1141_s18  ;;  %p1147_p7 = scmp.lt.s32.totalorder %s1141_s18, %s1141_s18 }
  0x13   :  { %p1148_p8 = por %p1147_p7, %p1146_p6 }
  0x15   :  { %p1149_p9 = pnand %p1148_p8, %p1142_p5 }
  0x17   :  { %1152 = shalt.err (!%p1149_p9)
}
  0x18   :  { %33 = dma.hbm_to_vmem [thread:$0]  %s1516_s1, 2048, %s28_s17, [#allocation7], %s1180_s12, %s1180_s12, %s1181_s13  }
  0x19   :  { %1173 = dma.done.wait [#allocation4], 1024  }
  0x1a   :  { %1174 = vsyncadd [#allocation4], 4294966272 }
  0x1b   :  { %1175 = dma.done.wait [#allocation7], 2048  }
  0x1c   :  { %1176 = vsyncadd [#allocation7], 4294965248  ;;  %v1183_v0 = vmov 0.0   ;;  %vm1184_vm0 = vmmov 0   ;;  %v1213_v1 = vld [vmem:[#allocation6 + $0x78] sm:$0xff]  ;;  %v1215_v2 = vld [vmem:[#allocation6 + $0x70] sm:$0xff] }
  0x1d   :  { %810 = vmatprep.subr.mxu0 %v1183_v0  ;;  %842 = vmatprep.mubr.msk.f32.mxu0 %vm1184_vm0, %v1183_v0  ;;  %v1220_v3 = vld [vmem:[#allocation6 + $0x68] sm:$0xff]  ;;  %v1226_v4 = vld [vmem:[#allocation6 + $0x60] sm:$0xff]  ;;  %v1232_v5 = vld [vmem:[#allocation6 + $0x58] sm:$0xff]  ;;  %s1185_s0 = smov [#allocation8]  }
  0x1e   :  { %845 = vmatprep.subr.mxu1 %v1183_v0  ;;  %877 = vmatprep.mubr.msk.f32.mxu1 %vm1184_vm0, %v1183_v0  ;;  %v1238_v6 = vld [vmem:[#allocation6 + $0x50] sm:$0xff]  ;;  %v1244_v7 = vld [vmem:[#allocation6 + $0x48] sm:$0xff]  ;;  %v1250_v8 = vld [vmem:[#allocation6 + $0x40] sm:$0xff]  ;;  %s664_s1 = sshll.u32 %s1185_s0, 4  ;;  %s665_s1 = int_to_ptr.vmem [resolvable:$true] %s664_s1 }
  0x1f   :  { %811 = vmatpush3.msra.mxu0 %v1213_v1  ;;  %846 = vmatpush3.msra.mxu1 %v1213_v1  ;;  %v1256_v9 = vld [vmem:[#allocation6 + $0x38] sm:$0xff]  ;;  %v1262_v10 = vld [vmem:[#allocation6 + $0x30] sm:$0xff]  ;;  %v1268_v11 = vld [vmem:[#allocation6 + $0x28] sm:$0xff]  ;;  %s1153_s21 = scalar_lea.vmem %s665_s1, 128  ;;  %p1158_p11 = scmp.lt.s32.totalorder %s665_s1, %s665_s1 }
  0x20   :  { %812 = vmatprep.subr.mxu0 %v1183_v0  ;;  %847 = vmatprep.subr.mxu1 %v1183_v0  ;;  %v1274_v12 = vld [vmem:[#allocation6 + $0x20] sm:$0xff]  ;;  %v1280_v13 = vld [vmem:[#allocation6 + $0x18] sm:$0xff]  ;;  %v1286_v14 = vld [vmem:[#allocation6 + $0x10] sm:$0xff]  ;;  %p1154_p10 = scmp.ne.s32.totalorder %s665_s1, %s1153_s21  ;;  %p1159_p12 = scmp.lt.s32.totalorder %s1153_s21, %s1153_s21 }
  0x21   :  { %813 = vmatpush3.msra.mxu0 %v1215_v2  ;;  %848 = vmatpush3.msra.mxu1 %v1215_v2  ;;  %v1292_v15 = vld [vmem:[#allocation6 + $0x8] sm:$0xff]  ;;  %v1298_v16 = vld [vmem:[#allocation6] sm:$0xff]  ;;  %v210_v27 = vld [vmem:[#allocation3 + $0x10] sm:$0xff] }
  0x22   :  { %814 = vmatprep.subr.mxu0 %v1183_v0  ;;  %849 = vmatprep.subr.mxu1 %v1183_v0  ;;  %v62_v17 = vld [vmem:[#allocation3] sm:$0xff]  ;;  %v136_v22 = vld [vmem:[#allocation3 + $0x8] sm:$0xff]  ;;  %v284_v32 = vld [vmem:[#allocation3 + $0x18] sm:$0xff]  ;;  %p1160_p13 = por %p1159_p12, %p1158_p11 }
  0x23   :  { %815 = vmatpush3.msra.mxu0 %v1220_v3  ;;  %850 = vmatpush3.msra.mxu1 %v1220_v3  ;;  %v358_v37 = vld [vmem:[#allocation3 + $0x20] sm:$0xff]  ;;  %v432_v42 = vld [vmem:[#allocation3 + $0x28] sm:$0xff]  ;;  %v506_v47 = vld [vmem:[#allocation3 + $0x30] sm:$0xff] }
  0x24   :  { %816 = vmatprep.subr.mxu0 %v1183_v0  ;;  %851 = vmatprep.subr.mxu1 %v1183_v0  ;;  %v580_v52 = vld [vmem:[#allocation3 + $0x38] sm:$0xff]  ;;  %p1161_p0 = pnand %p1160_p13, %p1154_p10 }
  0x25   :  { %817 = vmatpush3.msra.mxu0 %v1226_v4  ;;  %852 = vmatpush3.msra.mxu1 %v1226_v4 }
  0x26   :  { %818 = vmatprep.subr.mxu0 %v1183_v0  ;;  %853 = vmatprep.subr.mxu1 %v1183_v0 }
  0x27   :  { %819 = vmatpush3.msra.mxu0 %v1232_v5  ;;  %854 = vmatpush3.msra.mxu1 %v1232_v5 }
  0x28   :  { %820 = vmatprep.subr.mxu0 %v1183_v0  ;;  %855 = vmatprep.subr.mxu1 %v1183_v0 }
  0x29   :  { %821 = vmatpush3.msra.mxu0 %v1238_v6  ;;  %856 = vmatpush3.msra.mxu1 %v1238_v6 }
  0x2a   :  { %822 = vmatprep.subr.mxu0 %v1183_v0  ;;  %857 = vmatprep.subr.mxu1 %v1183_v0 }
  0x2b   :  { %823 = vmatpush3.msra.mxu0 %v1244_v7  ;;  %858 = vmatpush3.msra.mxu1 %v1244_v7 }
  0x2c   :  { %824 = vmatprep.subr.mxu0 %v1183_v0  ;;  %859 = vmatprep.subr.mxu1 %v1183_v0 }
  0x2d   :  { %825 = vmatpush3.msra.mxu0 %v1250_v8  ;;  %860 = vmatpush3.msra.mxu1 %v1250_v8 }
  0x2e   :  { %826 = vmatprep.subr.mxu0 %v1183_v0  ;;  %861 = vmatprep.subr.mxu1 %v1183_v0 }
  0x2f   :  { %827 = vmatpush3.msra.mxu0 %v1256_v9  ;;  %862 = vmatpush3.msra.mxu1 %v1256_v9 }
  0x30   :  { %828 = vmatprep.subr.mxu0 %v1183_v0  ;;  %863 = vmatprep.subr.mxu1 %v1183_v0 }
  0x31   :  { %829 = vmatpush3.msra.mxu0 %v1262_v10  ;;  %864 = vmatpush3.msra.mxu1 %v1262_v10 }
  0x32   :  { %830 = vmatprep.subr.mxu0 %v1183_v0  ;;  %865 = vmatprep.subr.mxu1 %v1183_v0 }
  0x33   :  { %831 = vmatpush3.msra.mxu0 %v1268_v11  ;;  %866 = vmatpush3.msra.mxu1 %v1268_v11 }
  0x34   :  { %832 = vmatprep.subr.mxu0 %v1183_v0  ;;  %867 = vmatprep.subr.mxu1 %v1183_v0 }
  0x35   :  { %833 = vmatpush3.msra.mxu0 %v1274_v12  ;;  %868 = vmatpush3.msra.mxu1 %v1274_v12 }
  0x36   :  { %834 = vmatprep.subr.mxu0 %v1183_v0  ;;  %869 = vmatprep.subr.mxu1 %v1183_v0 }
  0x37   :  { %835 = vmatpush3.msra.mxu0 %v1280_v13  ;;  %870 = vmatpush3.msra.mxu1 %v1280_v13 }
  0x38   :  { %836 = vmatprep.subr.mxu0 %v1183_v0  ;;  %871 = vmatprep.subr.mxu1 %v1183_v0 }
  0x39   :  { %837 = vmatpush3.msra.mxu0 %v1286_v14  ;;  %872 = vmatpush3.msra.mxu1 %v1286_v14 }
  0x3a   :  { %838 = vmatprep.subr.mxu0 %v1183_v0  ;;  %873 = vmatprep.subr.mxu1 %v1183_v0 }
  0x3b   :  { %839 = vmatpush3.msra.mxu0 %v1292_v15  ;;  %874 = vmatpush3.msra.mxu1 %v1292_v15 }
  0x3c   :  { %840 = vmatprep.subr.mxu0 %v1183_v0  ;;  %875 = vmatprep.subr.mxu1 %v1183_v0 }
  0x3d   :  { %841 = vmatpush3.msra.mxu0 %v1298_v16  ;;  %876 = vmatpush3.msra.mxu1 %v1298_v16 }
  0x3e   :  { %843 = vmatmul.mubr.f32.vlgmr.msra.gmra.mxu0 %v1183_v0  ;;  %880 = vmatprep.subr.mxu0 %v1183_v0 }
  0x3f   :  { %881 = vmatpush3.msra.mxu0 %v1213_v1  ;;  %912 = vmatprep.mubr.msk.f32.mxu0 %vm1184_vm0, %v1183_v0 }
  0x40   :  { %882 = vmatprep.subr.mxu0 %v1183_v0  ;;  %915 = vmatprep.subr.mxu1 %v1183_v0 }
  0x41   :  { %883 = vmatpush3.msra.mxu0 %v1215_v2 }
  0x42   :  { %884 = vmatprep.subr.mxu0 %v1183_v0 }
  0x43   :  { %885 = vmatpush3.msra.mxu0 %v1220_v3 }
  0x44   :  { %886 = vmatprep.subr.mxu0 %v1183_v0 }
  0x45   :  { %887 = vmatpush3.msra.mxu0 %v1226_v4 }
  0x46   :  { %888 = vmatprep.subr.mxu0 %v1183_v0 }
  0x47   :  { %889 = vmatpush3.msra.mxu0 %v1232_v5 }
  0x48   :  { %890 = vmatprep.subr.mxu0 %v1183_v0 }
  0x49   :  { %891 = vmatpush3.msra.mxu0 %v1238_v6 }
  0x4a   :  { %892 = vmatprep.subr.mxu0 %v1183_v0 }
  0x4b   :  { %893 = vmatpush3.msra.mxu0 %v1244_v7 }
  0x4c   :  { %894 = vmatprep.subr.mxu0 %v1183_v0 }
  0x4d   :  { %895 = vmatpush3.msra.mxu0 %v1250_v8 }
  0x4e   :  { %896 = vmatprep.subr.mxu0 %v1183_v0 }
  0x4f   :  { %897 = vmatpush3.msra.mxu0 %v1256_v9 }
  0x50   :  { %898 = vmatprep.subr.mxu0 %v1183_v0 }
  0x51   :  { %899 = vmatpush3.msra.mxu0 %v1262_v10 }
  0x52   :  { %900 = vmatprep.subr.mxu0 %v1183_v0 }
  0x53   :  { %901 = vmatpush3.msra.mxu0 %v1268_v11 }
  0x54   :  { %902 = vmatprep.subr.mxu0 %v1183_v0 }
  0x55   :  { %903 = vmatpush3.msra.mxu0 %v1274_v12 }
  0x56   :  { %904 = vmatprep.subr.mxu0 %v1183_v0 }
  0x57   :  { %905 = vmatpush3.msra.mxu0 %v1280_v13 }
  0x58   :  { %906 = vmatprep.subr.mxu0 %v1183_v0 }
  0x59   :  { %907 = vmatpush3.msra.mxu0 %v1286_v14 }
  0x5a   :  { %908 = vmatprep.subr.mxu0 %v1183_v0 }
  0x5b   :  { %909 = vmatpush3.msra.mxu0 %v1292_v15 }
  0x5c   :  { %910 = vmatprep.subr.mxu0 %v1183_v0 }
  0x5d   :  { %911 = vmatpush3.msra.mxu0 %v1298_v16 }
  0x5e   :  { %950 = vmatprep.subr.mxu0 %v1183_v0 }
  0xfe   :  { %v129_v18 = vpop.f32.mrf.mxu0 }
  0xff   :  { %v133_v19 = vadd.f32 %v129_v18, %v62_v17 }
 0x100   :  { %v844_v20 = vpop.f32.mrf.mxu0 }
 0x101   :  { %1097 = vtanh.f32 %v133_v19 }
 0x10e   :  { %v1098_v21 = vpop.eup %1097 }
 0x10f   :  { %878 = vmatmul.mubr.f32.vlgmr.msra.gmra.mxu1 %v1098_v21 }
 0x110   :  { %916 = vmatpush3.msra.mxu1 %v1213_v1  ;;  %947 = vmatprep.mubr.msk.f32.mxu1 %vm1184_vm0, %v1183_v0 }
 0x111   :  { %917 = vmatprep.subr.mxu1 %v1183_v0 }
 0x112   :  { %918 = vmatpush3.msra.mxu1 %v1215_v2 }
 0x113   :  { %919 = vmatprep.subr.mxu1 %v1183_v0 }
 0x114   :  { %920 = vmatpush3.msra.mxu1 %v1220_v3 }
 0x115   :  { %921 = vmatprep.subr.mxu1 %v1183_v0 }
 0x116   :  { %922 = vmatpush3.msra.mxu1 %v1226_v4 }
 0x117   :  { %923 = vmatprep.subr.mxu1 %v1183_v0 }
 0x118   :  { %924 = vmatpush3.msra.mxu1 %v1232_v5 }
 0x119   :  { %925 = vmatprep.subr.mxu1 %v1183_v0 }
 0x11a   :  { %926 = vmatpush3.msra.mxu1 %v1238_v6 }
 0x11b   :  { %927 = vmatprep.subr.mxu1 %v1183_v0 }
 0x11c   :  { %928 = vmatpush3.msra.mxu1 %v1244_v7 }
 0x11d   :  { %929 = vmatprep.subr.mxu1 %v1183_v0 }
 0x11e   :  { %930 = vmatpush3.msra.mxu1 %v1250_v8 }
 0x11f   :  { %931 = vmatprep.subr.mxu1 %v1183_v0 }
 0x120   :  { %932 = vmatpush3.msra.mxu1 %v1256_v9 }
 0x121   :  { %933 = vmatprep.subr.mxu1 %v1183_v0 }
 0x122   :  { %934 = vmatpush3.msra.mxu1 %v1262_v10 }
 0x123   :  { %935 = vmatprep.subr.mxu1 %v1183_v0 }
 0x124   :  { %936 = vmatpush3.msra.mxu1 %v1268_v11 }
 0x125   :  { %937 = vmatprep.subr.mxu1 %v1183_v0 }
 0x126   :  { %938 = vmatpush3.msra.mxu1 %v1274_v12 }
 0x127   :  { %939 = vmatprep.subr.mxu1 %v1183_v0 }
 0x128   :  { %940 = vmatpush3.msra.mxu1 %v1280_v13 }
 0x129   :  { %941 = vmatprep.subr.mxu1 %v1183_v0 }
 0x12a   :  { %942 = vmatpush3.msra.mxu1 %v1286_v14 }
 0x12b   :  { %943 = vmatprep.subr.mxu1 %v1183_v0 }
 0x12c   :  { %944 = vmatpush3.msra.mxu1 %v1292_v15 }
 0x12d   :  { %945 = vmatprep.subr.mxu1 %v1183_v0 }
 0x12e   :  { %946 = vmatpush3.msra.mxu1 %v1298_v16 }
 0x12f   :  { %985 = vmatprep.subr.mxu1 %v1183_v0 }
 0x1cf   :  { %v203_v23 = vpop.f32.mrf.mxu1 }
 0x1d0   :  { %v207_v24 = vadd.f32 %v203_v23, %v136_v22 }
 0x1d1   :  { %v879_v25 = vpop.f32.mrf.mxu1 }
 0x1d2   :  { %1099 = vtanh.f32 %v207_v24 }
 0x1df   :  { %v1100_v26 = vpop.eup %1099 }
 0x1e0   :  { %913 = vmatmul.mubr.f32.vlgmr.msra.gmra.mxu0 %v1100_v26 }
 0x1e1   :  { %951 = vmatpush3.msra.mxu0 %v1213_v1  ;;  %982 = vmatprep.mubr.msk.f32.mxu0 %vm1184_vm0, %v1183_v0 }
 0x1e2   :  { %952 = vmatprep.subr.mxu0 %v1183_v0 }
 0x1e3   :  { %953 = vmatpush3.msra.mxu0 %v1215_v2 }
 0x1e4   :  { %954 = vmatprep.subr.mxu0 %v1183_v0 }
 0x1e5   :  { %955 = vmatpush3.msra.mxu0 %v1220_v3 }
 0x1e6   :  { %956 = vmatprep.subr.mxu0 %v1183_v0 }
 0x1e7   :  { %957 = vmatpush3.msra.mxu0 %v1226_v4 }
 0x1e8   :  { %958 = vmatprep.subr.mxu0 %v1183_v0 }
 0x1e9   :  { %959 = vmatpush3.msra.mxu0 %v1232_v5 }
 0x1ea   :  { %960 = vmatprep.subr.mxu0 %v1183_v0 }
 0x1eb   :  { %961 = vmatpush3.msra.mxu0 %v1238_v6 }
 0x1ec   :  { %962 = vmatprep.subr.mxu0 %v1183_v0 }
 0x1ed   :  { %963 = vmatpush3.msra.mxu0 %v1244_v7 }
 0x1ee   :  { %964 = vmatprep.subr.mxu0 %v1183_v0 }
 0x1ef   :  { %965 = vmatpush3.msra.mxu0 %v1250_v8 }
 0x1f0   :  { %966 = vmatprep.subr.mxu0 %v1183_v0 }
 0x1f1   :  { %967 = vmatpush3.msra.mxu0 %v1256_v9 }
 0x1f2   :  { %968 = vmatprep.subr.mxu0 %v1183_v0 }
 0x1f3   :  { %969 = vmatpush3.msra.mxu0 %v1262_v10 }
 0x1f4   :  { %970 = vmatprep.subr.mxu0 %v1183_v0 }
 0x1f5   :  { %971 = vmatpush3.msra.mxu0 %v1268_v11 }
 0x1f6   :  { %972 = vmatprep.subr.mxu0 %v1183_v0 }
 0x1f7   :  { %973 = vmatpush3.msra.mxu0 %v1274_v12 }
 0x1f8   :  { %974 = vmatprep.subr.mxu0 %v1183_v0 }
 0x1f9   :  { %975 = vmatpush3.msra.mxu0 %v1280_v13 }
 0x1fa   :  { %976 = vmatprep.subr.mxu0 %v1183_v0 }
 0x1fb   :  { %977 = vmatpush3.msra.mxu0 %v1286_v14 }
 0x1fc   :  { %978 = vmatprep.subr.mxu0 %v1183_v0 }
 0x1fd   :  { %979 = vmatpush3.msra.mxu0 %v1292_v15 }
 0x1fe   :  { %980 = vmatprep.subr.mxu0 %v1183_v0 }
 0x1ff   :  { %981 = vmatpush3.msra.mxu0 %v1298_v16 }
 0x200   :  { %1020 = vmatprep.subr.mxu0 %v1183_v0 }
 0x2a0   :  { %v277_v28 = vpop.f32.mrf.mxu0 }
 0x2a1   :  { %v281_v29 = vadd.f32 %v277_v28, %v210_v27 }
 0x2a2   :  { %v914_v30 = vpop.f32.mrf.mxu0 }
 0x2a3   :  { %1101 = vtanh.f32 %v281_v29 }
 0x2b0   :  { %v1102_v31 = vpop.eup %1101 }
 0x2b1   :  { %948 = vmatmul.mubr.f32.vlgmr.msra.gmra.mxu1 %v1102_v31 }
 0x2b2   :  { %986 = vmatpush3.msra.mxu1 %v1213_v1  ;;  %1017 = vmatprep.mubr.msk.f32.mxu1 %vm1184_vm0, %v1183_v0 }
 0x2b3   :  { %987 = vmatprep.subr.mxu1 %v1183_v0 }
 0x2b4   :  { %988 = vmatpush3.msra.mxu1 %v1215_v2 }
 0x2b5   :  { %989 = vmatprep.subr.mxu1 %v1183_v0 }
 0x2b6   :  { %990 = vmatpush3.msra.mxu1 %v1220_v3 }
 0x2b7   :  { %991 = vmatprep.subr.mxu1 %v1183_v0 }
 0x2b8   :  { %992 = vmatpush3.msra.mxu1 %v1226_v4 }
 0x2b9   :  { %993 = vmatprep.subr.mxu1 %v1183_v0 }
 0x2ba   :  { %994 = vmatpush3.msra.mxu1 %v1232_v5 }
 0x2bb   :  { %995 = vmatprep.subr.mxu1 %v1183_v0 }
 0x2bc   :  { %996 = vmatpush3.msra.mxu1 %v1238_v6 }
 0x2bd   :  { %997 = vmatprep.subr.mxu1 %v1183_v0 }
 0x2be   :  { %998 = vmatpush3.msra.mxu1 %v1244_v7 }
 0x2bf   :  { %999 = vmatprep.subr.mxu1 %v1183_v0 }
 0x2c0   :  { %1000 = vmatpush3.msra.mxu1 %v1250_v8 }
 0x2c1   :  { %1001 = vmatprep.subr.mxu1 %v1183_v0 }
 0x2c2   :  { %1002 = vmatpush3.msra.mxu1 %v1256_v9 }
 0x2c3   :  { %1003 = vmatprep.subr.mxu1 %v1183_v0 }
 0x2c4   :  { %1004 = vmatpush3.msra.mxu1 %v1262_v10 }
 0x2c5   :  { %1005 = vmatprep.subr.mxu1 %v1183_v0 }
 0x2c6   :  { %1006 = vmatpush3.msra.mxu1 %v1268_v11 }
 0x2c7   :  { %1007 = vmatprep.subr.mxu1 %v1183_v0 }
 0x2c8   :  { %1008 = vmatpush3.msra.mxu1 %v1274_v12 }
 0x2c9   :  { %1009 = vmatprep.subr.mxu1 %v1183_v0 }
 0x2ca   :  { %1010 = vmatpush3.msra.mxu1 %v1280_v13 }
 0x2cb   :  { %1011 = vmatprep.subr.mxu1 %v1183_v0 }
 0x2cc   :  { %1012 = vmatpush3.msra.mxu1 %v1286_v14 }
 0x2cd   :  { %1013 = vmatprep.subr.mxu1 %v1183_v0 }
 0x2ce   :  { %1014 = vmatpush3.msra.mxu1 %v1292_v15 }
 0x2cf   :  { %1015 = vmatprep.subr.mxu1 %v1183_v0 }
 0x2d0   :  { %1016 = vmatpush3.msra.mxu1 %v1298_v16 }
 0x2d1   :  { %1055 = vmatprep.subr.mxu1 %v1183_v0 }
 0x371   :  { %v351_v33 = vpop.f32.mrf.mxu1 }
 0x372   :  { %v355_v34 = vadd.f32 %v351_v33, %v284_v32 }
 0x373   :  { %v949_v35 = vpop.f32.mrf.mxu1 }
 0x374   :  { %1103 = vtanh.f32 %v355_v34 }
 0x381   :  { %v1104_v36 = vpop.eup %1103 }
 0x382   :  { %983 = vmatmul.mubr.f32.vlgmr.msra.gmra.mxu0 %v1104_v36 }
 0x383   :  { %1021 = vmatpush3.msra.mxu0 %v1213_v1  ;;  %1052 = vmatprep.mubr.msk.f32.mxu0 %vm1184_vm0, %v1183_v0 }
 0x384   :  { %1022 = vmatprep.subr.mxu0 %v1183_v0 }
 0x385   :  { %1023 = vmatpush3.msra.mxu0 %v1215_v2 }
 0x386   :  { %1024 = vmatprep.subr.mxu0 %v1183_v0 }
 0x387   :  { %1025 = vmatpush3.msra.mxu0 %v1220_v3 }
 0x388   :  { %1026 = vmatprep.subr.mxu0 %v1183_v0 }
 0x389   :  { %1027 = vmatpush3.msra.mxu0 %v1226_v4 }
 0x38a   :  { %1028 = vmatprep.subr.mxu0 %v1183_v0 }
 0x38b   :  { %1029 = vmatpush3.msra.mxu0 %v1232_v5 }
 0x38c   :  { %1030 = vmatprep.subr.mxu0 %v1183_v0 }
 0x38d   :  { %1031 = vmatpush3.msra.mxu0 %v1238_v6 }
 0x38e   :  { %1032 = vmatprep.subr.mxu0 %v1183_v0 }
 0x38f   :  { %1033 = vmatpush3.msra.mxu0 %v1244_v7 }
 0x390   :  { %1034 = vmatprep.subr.mxu0 %v1183_v0 }
 0x391   :  { %1035 = vmatpush3.msra.mxu0 %v1250_v8 }
 0x392   :  { %1036 = vmatprep.subr.mxu0 %v1183_v0 }
 0x393   :  { %1037 = vmatpush3.msra.mxu0 %v1256_v9 }
 0x394   :  { %1038 = vmatprep.subr.mxu0 %v1183_v0 }
 0x395   :  { %1039 = vmatpush3.msra.mxu0 %v1262_v10 }
 0x396   :  { %1040 = vmatprep.subr.mxu0 %v1183_v0 }
 0x397   :  { %1041 = vmatpush3.msra.mxu0 %v1268_v11 }
 0x398   :  { %1042 = vmatprep.subr.mxu0 %v1183_v0 }
 0x399   :  { %1043 = vmatpush3.msra.mxu0 %v1274_v12 }
 0x39a   :  { %1044 = vmatprep.subr.mxu0 %v1183_v0 }
 0x39b   :  { %1045 = vmatpush3.msra.mxu0 %v1280_v13 }
 0x39c   :  { %1046 = vmatprep.subr.mxu0 %v1183_v0 }
 0x39d   :  { %1047 = vmatpush3.msra.mxu0 %v1286_v14 }
 0x39e   :  { %1048 = vmatprep.subr.mxu0 %v1183_v0 }
 0x39f   :  { %1049 = vmatpush3.msra.mxu0 %v1292_v15 }
 0x3a0   :  { %1050 = vmatprep.subr.mxu0 %v1183_v0 }
 0x3a1   :  { %1051 = vmatpush3.msra.mxu0 %v1298_v16 }
 0x442   :  { %v425_v38 = vpop.f32.mrf.mxu0 }
 0x443   :  { %v429_v39 = vadd.f32 %v425_v38, %v358_v37 }
 0x444   :  { %v984_v40 = vpop.f32.mrf.mxu0 }
 0x445   :  { %1105 = vtanh.f32 %v429_v39 }
 0x452   :  { %v1106_v41 = vpop.eup %1105 }
 0x453   :  { %1018 = vmatmul.mubr.f32.vlgmr.msra.gmra.mxu1 %v1106_v41 }
 0x454   :  { %1056 = vmatpush3.msra.mxu1 %v1213_v1  ;;  %1087 = vmatprep.mubr.msk.f32.mxu1 %vm1184_vm0, %v1183_v0 }
 0x455   :  { %1057 = vmatprep.subr.mxu1 %v1183_v0 }
 0x456   :  { %1058 = vmatpush3.msra.mxu1 %v1215_v2 }
 0x457   :  { %1059 = vmatprep.subr.mxu1 %v1183_v0 }
 0x458   :  { %1060 = vmatpush3.msra.mxu1 %v1220_v3 }
 0x459   :  { %1061 = vmatprep.subr.mxu1 %v1183_v0 }
 0x45a   :  { %1062 = vmatpush3.msra.mxu1 %v1226_v4 }
 0x45b   :  { %1063 = vmatprep.subr.mxu1 %v1183_v0 }
 0x45c   :  { %1064 = vmatpush3.msra.mxu1 %v1232_v5 }
 0x45d   :  { %1065 = vmatprep.subr.mxu1 %v1183_v0 }
 0x45e   :  { %1066 = vmatpush3.msra.mxu1 %v1238_v6 }
 0x45f   :  { %1067 = vmatprep.subr.mxu1 %v1183_v0 }
 0x460   :  { %1068 = vmatpush3.msra.mxu1 %v1244_v7 }
 0x461   :  { %1069 = vmatprep.subr.mxu1 %v1183_v0 }
 0x462   :  { %1070 = vmatpush3.msra.mxu1 %v1250_v8 }
 0x463   :  { %1071 = vmatprep.subr.mxu1 %v1183_v0 }
 0x464   :  { %1072 = vmatpush3.msra.mxu1 %v1256_v9 }
 0x465   :  { %1073 = vmatprep.subr.mxu1 %v1183_v0 }
 0x466   :  { %1074 = vmatpush3.msra.mxu1 %v1262_v10 }
 0x467   :  { %1075 = vmatprep.subr.mxu1 %v1183_v0 }
 0x468   :  { %1076 = vmatpush3.msra.mxu1 %v1268_v11 }
 0x469   :  { %1077 = vmatprep.subr.mxu1 %v1183_v0 }
 0x46a   :  { %1078 = vmatpush3.msra.mxu1 %v1274_v12 }
 0x46b   :  { %1079 = vmatprep.subr.mxu1 %v1183_v0 }
 0x46c   :  { %1080 = vmatpush3.msra.mxu1 %v1280_v13 }
 0x46d   :  { %1081 = vmatprep.subr.mxu1 %v1183_v0 }
 0x46e   :  { %1082 = vmatpush3.msra.mxu1 %v1286_v14 }
 0x46f   :  { %1083 = vmatprep.subr.mxu1 %v1183_v0 }
 0x470   :  { %1084 = vmatpush3.msra.mxu1 %v1292_v15 }
 0x471   :  { %1085 = vmatprep.subr.mxu1 %v1183_v0 }
 0x472   :  { %1086 = vmatpush3.msra.mxu1 %v1298_v16 }
 0x513   :  { %v499_v43 = vpop.f32.mrf.mxu1 }
 0x514   :  { %v503_v44 = vadd.f32 %v499_v43, %v432_v42 }
 0x515   :  { %v1019_v45 = vpop.f32.mrf.mxu1 }
 0x516   :  { %1107 = vtanh.f32 %v503_v44 }
 0x523   :  { %v1108_v46 = vpop.eup %1107 }
 0x524   :  { %1053 = vmatmul.mubr.f32.vlgmr.msra.gmra.mxu0 %v1108_v46 }
 0x5e4   :  { %v573_v48 = vpop.f32.mrf.mxu0 }
 0x5e5   :  { %v577_v49 = vadd.f32 %v573_v48, %v506_v47 }
 0x5e6   :  { %v1054_v50 = vpop.f32.mrf.mxu0 }
 0x5e7   :  { %1109 = vtanh.f32 %v577_v49 }
 0x5f4   :  { %v1110_v51 = vpop.eup %1109 }
 0x5f5   :  { %1088 = vmatmul.mubr.f32.vlgmr.msra.gmra.mxu1 %v1110_v51 }
 0x6b5   :  { %v647_v53 = vpop.f32.mrf.mxu1 }
 0x6b6   :  { %v651_v54 = vadd.f32 %v647_v53, %v580_v52 }
 0x6b7   :  { %v1089_v55 = vpop.f32.mrf.mxu1 }
 0x6b8   :  { %1111 = vtanh.f32 %v651_v54 }
 0x6c5   :  { %v1112_v56 = vpop.eup %1111 }
 0x6c6   :  { %657 = vst [vmem:[#allocation8] sm:$0xff] %v1112_v56 }
 0x6c7   :  { %1164 = shalt.err (!%p1161_p0)
}
 0x6c8   :  { %667 = dma.vmem_to_hbm [thread:$0]  %s665_s1, 128, %s1517_s2, [#allocation5]  }
 0x6c9   :  { %1177 = dma.done.wait [#allocation5], 128  }
 0x6ca   :  { %1178 = vsyncadd [#allocation5], 4294967168 }
 0x6cb   :  { %671 = vsyncpa [#allocation4], 1 }
 0x6cc   :  { %672 = vsyncpa [#allocation7], 1 }
 0x6cd   :  { %673 = vsyncpa [#allocation5], 1 }

</bundles_post_ra>
